<compile_context>
chip_gen: v5e
topology: v5e:2x2
jax: 0.10.0
libtpu: 0.0.40
codegen_flags: <defaults>
</compile_context>

<pallas_src>
import jax
import jax.numpy as jnp
import numpy as np
from jax.experimental import pallas as pl
from jax.experimental.pallas import tpu as pltpu

NUM_HEADS = 2


# ----------------------------------------------------------------------------
# Fused kernel: attention half + lightconv half, one batch element per step.
# ----------------------------------------------------------------------------
def _make_fused_kernel(T, S, D, Kc, need_weights):
    head_dim = D // NUM_HEADS
    scale = float(head_dim) ** -0.5
    pad = (Kc - 1) // 2

    def kernel(q_ref, k_ref, v_ref, bias_ref, qmask_ref,
               wq_ref, wk_ref, wv_ref, wo_ref,
               bq_ref, bk_ref, bv_ref, bo_ref,
               ws_ref, bc_ref, *out_refs):
        out_ref = out_refs[0]

        x = q_ref[0]       # (T, E)  this batch element's query rows
        xk = k_ref[0]      # (S, E)
        xv = v_ref[0]      # (S, E)

        # ------------- branch 0: multi-head attention on channels [0, D) -----
        def proj(inp, w_ref, b_ref):
            # PyTorch nn.Linear: y = x @ W^T + b, W is (out, in).
            y = jax.lax.dot_general(inp, w_ref[...], (((1,), (1,)), ((), ())),
                                    preferred_element_type=jnp.float32)
            return y + b_ref[...]

        Q = proj(x[:, :D], wq_ref, bq_ref) * scale   # (T, D)
        K = proj(xk[:, :D], wk_ref, bk_ref)          # (S, D)
        V = proj(xv[:, :D], wv_ref, bv_ref)          # (S, D)

        # Hoisted out of the head loop (JAX does not CSE broadcast_in_dim).
        bias_ts = jnp.broadcast_to(bias_ref[0], (T, S))          # (T, S)
        lane = jax.lax.broadcasted_iota(jnp.int32, (1, D), 1)    # (1, D)

        ctx = jnp.zeros((T, D), jnp.float32)
        attn_sum = jnp.zeros((T, S), jnp.float32)
        for h in range(NUM_HEADS):                   # static unroll over heads
            lo = h * head_dim
            # Lane mask instead of sub-lane-tile slicing: masked full-width
            # matmuls are algebraically identical to the per-head slices and
            # avoid per-head XLU relayouts of Q/K/V.
            m_h = ((lane >= lo) & (lane < lo + head_dim)).astype(jnp.float32)
            s_h = jax.lax.dot_general(Q * m_h, K, (((1,), (1,)), ((), ())),
                                      preferred_element_type=jnp.float32)
            s_h = s_h + bias_ts
            s_h = s_h - jnp.max(s_h, axis=-1, keepdims=True)
            p = jnp.exp(s_h)
            p = p * pl.reciprocal(jnp.sum(p, axis=-1, keepdims=True),
                                  approx=True)
            attn_sum = attn_sum + p
            # p @ (V * m_h) fills exactly head h's output columns, zero elsewhere.
            ctx = ctx + jnp.dot(p, V * m_h, preferred_element_type=jnp.float32)

        # Single output projection (no per-head Wo column slicing).
        x0 = jax.lax.dot_general(ctx, wo_ref[...], (((1,), (1,)), ((), ())),
                                 preferred_element_type=jnp.float32) + bo_ref[...]

        # ------- branch 1: lightweight depthwise conv on channels [D, 2D) ----
        xc = x[:, D:2 * D] * qmask_ref[0]            # (T, D), padded rows zeroed
        row = jax.lax.broadcasted_iota(jnp.int32, (T, 1), 0)
        acc = jnp.zeros((T, D), jnp.float32)
        for k in range(Kc):                          # static unroll over taps
            d = k - pad                              # time offset of this tap
            tap = ws_ref[k:k + 1, :]                 # (1, D) pre-softmaxed tap
            if d == 0:
                acc = acc + tap * xc
            else:
                shifted = pltpu.roll(xc, shift=(-d) % T, axis=0)  # XLU rotate
                valid = (row >= max(0, -d)) & (row <= min(T - 1, T - 1 - d))
                acc = acc + tap * jnp.where(valid, shifted, 0.0)
        x1 = acc + bc_ref[...]

        # One lane-contiguous (T, E) output slab: the channel concat is done in
        # VMEM, no separate XLA concatenate / extra HBM round trip.
        out_ref[0] = jnp.concatenate([x0, x1], axis=-1).astype(out_ref.dtype)
        if need_weights:
            attnw_ref = out_refs[1]
            attnw_ref[0] = (attn_sum * (1.0 / NUM_HEADS)).astype(attnw_ref.dtype)

    return kernel


# ----------------------------------------------------------------------------
# MultiBranch.forward
# ----------------------------------------------------------------------------
def multibranch_forward(query, key, value, params, key_padding_mask=None,
                        need_weights=True):
    # query/key/value: (T, B, E) as in fairseq; returns ((T, B, E), (B, T, S)|None)
    T, B, E = query.shape
    S = key.shape[0]
    D = E // 2

    wq, wk, wv, wo, bq, bk, bv, bo = params["attn"]
    wc, bc = params["conv"]
    Kc = wc.shape[0]

    # Conv tap softmax hoisted out of the kernel (identical for every batch
    # element / grid step).
    ws = jax.nn.softmax(wc, axis=0)                  # (Kc, D)

    # Batch-major activations; channel split / concat happen inside the kernel.
    q_bte = jnp.transpose(query, (1, 0, 2))          # (B, T, E)
    k_bte = jnp.transpose(key, (1, 0, 2))            # (B, S, E)
    v_bte = jnp.transpose(value, (1, 0, 2))          # (B, S, E)

    if key_padding_mask is None:
        bias = jnp.zeros((B, 1, S), jnp.float32)
        qmask = jnp.ones((B, T, 1), jnp.float32)
    else:
        bias = jnp.where(key_padding_mask[:, None, :], -1e9, 0.0
                         ).astype(jnp.float32)
        # conv-branch masking assumes tgt_len == src_len (fairseq usage).
        qmask = jnp.where(key_padding_mask, 0.0, 1.0
                          ).astype(jnp.float32)[:, :, None]

    kernel = _make_fused_kernel(T, S, D, Kc, need_weights)

    out_struct = jax.ShapeDtypeStruct((B, T, E), jnp.float32)
    out_spec = pl.BlockSpec((1, T, E), lambda b: (b, 0, 0))
    if need_weights:
        out_shape = (out_struct, jax.ShapeDtypeStruct((B, T, S), jnp.float32))
        out_specs = (out_spec, pl.BlockSpec((1, T, S), lambda b: (b, 0, 0)))
    else:
        out_shape = out_struct
        out_specs = out_spec

    wmat_spec = pl.BlockSpec((D, D), lambda b: (0, 0))
    wvec_spec = pl.BlockSpec((1, D), lambda b: (0, 0))

    # grid=(B,) "parallel": on v7x the two batch elements land on the two
    # TensorCores; on single-TC v5e/v6e this is just 2 short sequential steps.
    results = pl.pallas_call(
        kernel,
        out_shape=out_shape,
        grid=(B,),
        in_specs=[
            pl.BlockSpec((1, T, E), lambda b: (b, 0, 0)),   # query (full E)
            pl.BlockSpec((1, S, E), lambda b: (b, 0, 0)),   # key
            pl.BlockSpec((1, S, E), lambda b: (b, 0, 0)),   # value
            pl.BlockSpec((1, 1, S), lambda b: (b, 0, 0)),   # additive key bias
            pl.BlockSpec((1, T, 1), lambda b: (b, 0, 0)),   # conv time mask
            wmat_spec, wmat_spec, wmat_spec, wmat_spec,     # wq wk wv wo
            wvec_spec, wvec_spec, wvec_spec, wvec_spec,     # bq bk bv bo
            pl.BlockSpec((Kc, D), lambda b: (0, 0)),        # softmaxed taps
            wvec_spec,                                      # conv bias
        ],
        out_specs=out_specs,
        compiler_params=pltpu.CompilerParams(
            dimension_semantics=("parallel",)),
    )(q_bte, k_bte, v_bte, bias, qmask, wq, wk, wv, wo, bq, bk, bv, bo, ws, bc)

    if need_weights:
        out_bte, attn = results
    else:
        out_bte, attn = results, None

    return jnp.transpose(out_bte, (1, 0, 2)), attn


# ----------------------------------------------------------------------------
# Pure-JAX reference for verification
# ----------------------------------------------------------------------------
def _ref(query, key, value, params, key_padding_mask=None):
    T, B, E = query.shape
    S = key.shape[0]
    D = E // 2
    wq, wk, wv, wo, bq, bk, bv, bo = params["attn"]
    head_dim = D // NUM_HEADS
    scale = head_dim ** -0.5

    q = jnp.transpose(query[..., :D], (1, 0, 2))
    k = jnp.transpose(key[..., :D], (1, 0, 2))
    v = jnp.transpose(value[..., :D], (1, 0, 2))
    Q = q @ wq.T + bq
    K = k @ wk.T + bk
    V = v @ wv.T + bv
    Qh = Q.reshape(B, T, NUM_HEADS, head_dim).transpose(0, 2, 1, 3) * scale
    Kh = K.reshape(B, S, NUM_HEADS, head_dim).transpose(0, 2, 1, 3)
    Vh = V.reshape(B, S, NUM_HEADS, head_dim).transpose(0, 2, 1, 3)
    scores = jnp.einsum("bhtd,bhsd->bhts", Qh, Kh)
    if key_padding_mask is not None:
        scores = scores + jnp.where(key_padding_mask[:, None, None, :],
                                    -1e9, 0.0)
    p = jax.nn.softmax(scores, axis=-1)
    ctx = jnp.einsum("bhts,bhsd->bhtd", p, Vh
                     ).transpose(0, 2, 1, 3).reshape(B, T, D)
    x0 = ctx @ wo.T + bo
    attn = p.mean(axis=1)

    wc, bc = params["conv"]
    Kc = wc.shape[0]
    pad = (Kc - 1) // 2
    q1 = query[..., D:2 * D]
    if key_padding_mask is not None:
        q1 = jnp.where(jnp.transpose(key_padding_mask)[:, :, None], 0.0, q1)
    q1 = jnp.transpose(q1, (1, 0, 2))                 # (B, T, D)
    ws = jax.nn.softmax(wc, axis=0)                   # (Kc, D)
    padded = jnp.pad(q1, ((0, 0), (pad, pad), (0, 0)))
    x1 = sum(padded[:, kk:kk + T, :] * ws[kk][None, None, :]
             for kk in range(Kc)) + bc

    out = jnp.concatenate([x0, x1], axis=-1).transpose(1, 0, 2)
    return out, attn


if __name__ == "__main__":
    T, B, E = 8, 2, 32
    D = E // 2
    Kc = 3

    kq, kk, kv = jax.random.split(jax.random.PRNGKey(0), 3)
    query = jax.random.normal(kq, (T, B, E), jnp.float32)
    key = jax.random.normal(kk, (T, B, E), jnp.float32)
    value = jax.random.normal(kv, (T, B, E), jnp.float32)
    # True = padded position; last two keys of batch 1 are padding.
    key_padding_mask = jnp.zeros((B, T), dtype=bool).at[1, T - 2:].set(True)

    pkeys = jax.random.split(jax.random.PRNGKey(1), 10)

    def w(kk_, shape, scale=0.2):
        return scale * jax.random.normal(kk_, shape, jnp.float32)

    attn_params = (w(pkeys[0], (D, D)), w(pkeys[1], (D, D)),
                   w(pkeys[2], (D, D)), w(pkeys[3], (D, D)),
                   w(pkeys[4], (1, D), 0.05), w(pkeys[5], (1, D), 0.05),
                   w(pkeys[6], (1, D), 0.05), w(pkeys[7], (1, D), 0.05))
    conv_params = (w(pkeys[8], (Kc, D)), w(pkeys[9], (1, D), 0.05))
    params = {"attn": attn_params, "conv": conv_params}

    out, attn = multibranch_forward(query, key, value, params,
                                    key_padding_mask)
    out = jax.block_until_ready(out)
    attn = jax.block_until_ready(attn)

    ref_out, ref_attn = _ref(query, key, value, params, key_padding_mask)
    # Tolerance is set by the EUP approximate reciprocal used for the softmax
    # normalization (pl.reciprocal(approx=True)); everything else is exact f32.
    np.testing.assert_allclose(np.asarray(out), np.asarray(ref_out),
                               rtol=5e-3, atol=5e-3)
    np.testing.assert_allclose(np.asarray(attn), np.asarray(ref_attn),
                               rtol=5e-3, atol=5e-3)
    print("KERNEL_OK")
</pallas_src>

<mosaic_0001>
module attributes {stable_mosaic.version = 11 : i64} {
  func.func @kernel(%arg0: i32, %arg1: memref<1x8x32xf32, #tpu.memory_space<vmem>>, %arg2: memref<1x8x32xf32, #tpu.memory_space<vmem>>, %arg3: memref<1x8x32xf32, #tpu.memory_space<vmem>>, %arg4: memref<1x1x8xf32, #tpu.memory_space<vmem>>, %arg5: memref<1x8x1xf32, #tpu.memory_space<vmem>>, %arg6: memref<16x16xf32, #tpu.memory_space<vmem>>, %arg7: memref<16x16xf32, #tpu.memory_space<vmem>>, %arg8: memref<16x16xf32, #tpu.memory_space<vmem>>, %arg9: memref<16x16xf32, #tpu.memory_space<vmem>>, %arg10: memref<1x16xf32, #tpu.memory_space<vmem>>, %arg11: memref<1x16xf32, #tpu.memory_space<vmem>>, %arg12: memref<1x16xf32, #tpu.memory_space<vmem>>, %arg13: memref<1x16xf32, #tpu.memory_space<vmem>>, %arg14: memref<3x16xf32, #tpu.memory_space<vmem>>, %arg15: memref<1x16xf32, #tpu.memory_space<vmem>>, %arg16: memref<1x8x32xf32, #tpu.memory_space<vmem>>, %arg17: memref<1x8x8xf32, #tpu.memory_space<vmem>>) attributes {dimension_semantics = [#tpu.dimension_semantics<parallel>], iteration_bounds = array<i64: 2>, scalar_prefetch = 0 : i64, scratch_operands = 0 : i64, tpu.core_type = #tpu.core_type<tc>, window_params = [{transform_indices = @transform_0, window_bounds = array<i64: 1, 8, 32>}, {transform_indices = @transform_1, window_bounds = array<i64: 1, 8, 32>}, {transform_indices = @transform_2, window_bounds = array<i64: 1, 8, 32>}, {transform_indices = @transform_3, window_bounds = array<i64: 1, 1, 8>}, {transform_indices = @transform_4, window_bounds = array<i64: 1, 8, 1>}, {pipeline_mode = #tpu.pipeline_mode<synchronous>, transform_indices = @transform_5, window_bounds = array<i64: 16, 16>}, {pipeline_mode = #tpu.pipeline_mode<synchronous>, transform_indices = @transform_6, window_bounds = array<i64: 16, 16>}, {pipeline_mode = #tpu.pipeline_mode<synchronous>, transform_indices = @transform_7, window_bounds = array<i64: 16, 16>}, {pipeline_mode = #tpu.pipeline_mode<synchronous>, transform_indices = @transform_8, window_bounds = array<i64: 16, 16>}, {pipeline_mode = #tpu.pipeline_mode<synchronous>, transform_indices = @transform_9, window_bounds = array<i64: 1, 16>}, {pipeline_mode = #tpu.pipeline_mode<synchronous>, transform_indices = @transform_10, window_bounds = array<i64: 1, 16>}, {pipeline_mode = #tpu.pipeline_mode<synchronous>, transform_indices = @transform_11, window_bounds = array<i64: 1, 16>}, {pipeline_mode = #tpu.pipeline_mode<synchronous>, transform_indices = @transform_12, window_bounds = array<i64: 1, 16>}, {pipeline_mode = #tpu.pipeline_mode<synchronous>, transform_indices = @transform_13, window_bounds = array<i64: 3, 16>}, {pipeline_mode = #tpu.pipeline_mode<synchronous>, transform_indices = @transform_14, window_bounds = array<i64: 1, 16>}, {transform_indices = @transform_15, window_bounds = array<i64: 1, 8, 32>}, {transform_indices = @transform_16, window_bounds = array<i64: 1, 8, 8>}]} {
    %c0 = arith.constant 0 : index
    %c0_0 = arith.constant 0 : index
    %c0_1 = arith.constant 0 : index
    %0 = vector.load %arg1[%c0, %c0_0, %c0_1] : memref<1x8x32xf32, #tpu.memory_space<vmem>>, vector<1x8x32xf32>
    %1 = vector.shape_cast %0 : vector<1x8x32xf32> to vector<8x32xf32>
    %c0_2 = arith.constant 0 : index
    %c0_3 = arith.constant 0 : index
    %c0_4 = arith.constant 0 : index
    %2 = vector.load %arg2[%c0_2, %c0_3, %c0_4] : memref<1x8x32xf32, #tpu.memory_space<vmem>>, vector<1x8x32xf32>
    %3 = vector.shape_cast %2 : vector<1x8x32xf32> to vector<8x32xf32>
    %c0_5 = arith.constant 0 : index
    %c0_6 = arith.constant 0 : index
    %c0_7 = arith.constant 0 : index
    %4 = vector.load %arg3[%c0_5, %c0_6, %c0_7] : memref<1x8x32xf32, #tpu.memory_space<vmem>>, vector<1x8x32xf32>
    %5 = vector.shape_cast %4 : vector<1x8x32xf32> to vector<8x32xf32>
    %6 = vector.extract_strided_slice %1 {offsets = [0, 0], sizes = [8, 16], strides = [1, 1]} : vector<8x32xf32> to vector<8x16xf32>
    %c0_8 = arith.constant 0 : index
    %c0_9 = arith.constant 0 : index
    %7 = vector.load %arg6[%c0_8, %c0_9] : memref<16x16xf32, #tpu.memory_space<vmem>>, vector<16x16xf32>
    %cst = arith.constant dense<0.000000e+00> : vector<8x16xf32>
    %8 = tpu.matmul %6, %7, %cst {dimension_numbers = #tpu.dot_dimension_numbers<[1], [1], [0], [0], [0, 0, 1, 0], [], []>} : vector<8x16xf32>, vector<16x16xf32>, vector<8x16xf32> -> vector<8x16xf32>
    %c0_10 = arith.constant 0 : index
    %c0_11 = arith.constant 0 : index
    %9 = vector.load %arg10[%c0_10, %c0_11] : memref<1x16xf32, #tpu.memory_space<vmem>>, vector<1x16xf32>
    %10 = vector.broadcast %9 : vector<1x16xf32> to vector<8x16xf32>
    %11 = arith.addf %8, %10 : vector<8x16xf32>
    %cst_12 = arith.constant 0.353553385 : f32
    %12 = vector.broadcast %cst_12 : f32 to vector<8x16xf32>
    %13 = arith.mulf %11, %12 : vector<8x16xf32>
    %14 = vector.extract_strided_slice %3 {offsets = [0, 0], sizes = [8, 16], strides = [1, 1]} : vector<8x32xf32> to vector<8x16xf32>
    %c0_13 = arith.constant 0 : index
    %c0_14 = arith.constant 0 : index
    %15 = vector.load %arg7[%c0_13, %c0_14] : memref<16x16xf32, #tpu.memory_space<vmem>>, vector<16x16xf32>
    %cst_15 = arith.constant dense<0.000000e+00> : vector<8x16xf32>
    %16 = tpu.matmul %14, %15, %cst_15 {dimension_numbers = #tpu.dot_dimension_numbers<[1], [1], [0], [0], [0, 0, 1, 0], [], []>} : vector<8x16xf32>, vector<16x16xf32>, vector<8x16xf32> -> vector<8x16xf32>
    %c0_16 = arith.constant 0 : index
    %c0_17 = arith.constant 0 : index
    %17 = vector.load %arg11[%c0_16, %c0_17] : memref<1x16xf32, #tpu.memory_space<vmem>>, vector<1x16xf32>
    %18 = vector.broadcast %17 : vector<1x16xf32> to vector<8x16xf32>
    %19 = arith.addf %16, %18 : vector<8x16xf32>
    %20 = vector.extract_strided_slice %5 {offsets = [0, 0], sizes = [8, 16], strides = [1, 1]} : vector<8x32xf32> to vector<8x16xf32>
    %c0_18 = arith.constant 0 : index
    %c0_19 = arith.constant 0 : index
    %21 = vector.load %arg8[%c0_18, %c0_19] : memref<16x16xf32, #tpu.memory_space<vmem>>, vector<16x16xf32>
    %cst_20 = arith.constant dense<0.000000e+00> : vector<8x16xf32>
    %22 = tpu.matmul %20, %21, %cst_20 {dimension_numbers = #tpu.dot_dimension_numbers<[1], [1], [0], [0], [0, 0, 1, 0], [], []>} : vector<8x16xf32>, vector<16x16xf32>, vector<8x16xf32> -> vector<8x16xf32>
    %c0_21 = arith.constant 0 : index
    %c0_22 = arith.constant 0 : index
    %23 = vector.load %arg12[%c0_21, %c0_22] : memref<1x16xf32, #tpu.memory_space<vmem>>, vector<1x16xf32>
    %24 = vector.broadcast %23 : vector<1x16xf32> to vector<8x16xf32>
    %25 = arith.addf %22, %24 : vector<8x16xf32>
    %c0_23 = arith.constant 0 : index
    %c0_24 = arith.constant 0 : index
    %c0_25 = arith.constant 0 : index
    %26 = vector.load %arg4[%c0_23, %c0_24, %c0_25] : memref<1x1x8xf32, #tpu.memory_space<vmem>>, vector<1x1x8xf32>
    %27 = vector.shape_cast %26 : vector<1x1x8xf32> to vector<1x8xf32>
    %28 = vector.shape_cast %27 : vector<1x8xf32> to vector<1x8xf32>
    %29 = vector.broadcast %28 : vector<1x8xf32> to vector<8x8xf32>
    %30 = tpu.iota {dimensions = array<i32: 1>} : vector<1x16xi32>
    %cst_26 = arith.constant 0.000000e+00 : f32
    %31 = vector.broadcast %cst_26 : f32 to vector<8x16xf32>
    %cst_27 = arith.constant 0.000000e+00 : f32
    %32 = vector.broadcast %cst_27 : f32 to vector<8x8xf32>
    %c0_i32 = arith.constant 0 : i32
    %33 = vector.broadcast %c0_i32 : i32 to vector<1x16xi32>
    %34 = arith.cmpi sge, %30, %33 : vector<1x16xi32>
    %c8_i32 = arith.constant 8 : i32
    %35 = vector.broadcast %c8_i32 : i32 to vector<1x16xi32>
    %36 = arith.cmpi slt, %30, %35 : vector<1x16xi32>
    %37 = arith.andi %34, %36 : vector<1x16xi1>
    %38 = arith.extui %37 : vector<1x16xi1> to vector<1x16xi32>
    %39 = arith.sitofp %38 : vector<1x16xi32> to vector<1x16xf32>
    %40 = vector.broadcast %39 : vector<1x16xf32> to vector<8x16xf32>
    %41 = arith.mulf %13, %40 : vector<8x16xf32>
    %cst_28 = arith.constant dense<0.000000e+00> : vector<8x8xf32>
    %42 = tpu.matmul %41, %19, %cst_28 {dimension_numbers = #tpu.dot_dimension_numbers<[1], [1], [0], [0], [0, 0, 1, 0], [], []>} : vector<8x16xf32>, vector<8x16xf32>, vector<8x8xf32> -> vector<8x8xf32>
    %43 = arith.addf %42, %29 : vector<8x8xf32>
    %cst_29 = arith.constant dense<0xFF800000> : vector<8xf32>
    %44 = vector.multi_reduction <maximumf>, %43, %cst_29 [1] : vector<8x8xf32> to vector<8xf32>
    %45 = vector.shape_cast %44 : vector<8xf32> to vector<8x1xf32>
    %46 = vector.broadcast %45 : vector<8x1xf32> to vector<8x8xf32>
    %47 = arith.subf %43, %46 : vector<8x8xf32>
    %48 = math.exp %47 : vector<8x8xf32>
    %cst_30 = arith.constant dense<0.000000e+00> : vector<8xf32>
    %49 = vector.multi_reduction <add>, %48, %cst_30 [1] : vector<8x8xf32> to vector<8xf32>
    %50 = vector.shape_cast %49 : vector<8xf32> to vector<8x1xf32>
    %51 = tpu.reciprocal %50 {approx = true} : vector<8x1xf32> -> vector<8x1xf32>
    %52 = vector.broadcast %51 : vector<8x1xf32> to vector<8x8xf32>
    %53 = arith.mulf %48, %52 : vector<8x8xf32>
    %54 = arith.addf %32, %53 : vector<8x8xf32>
    %55 = vector.broadcast %39 : vector<1x16xf32> to vector<8x16xf32>
    %56 = arith.mulf %25, %55 : vector<8x16xf32>
    %cst_31 = arith.constant dense<0.000000e+00> : vector<8x16xf32>
    %57 = tpu.matmul %53, %56, %cst_31 {dimension_numbers = #tpu.dot_dimension_numbers<[1], [0], [0], [1], [0, 0, 1, 1], [], []>} : vector<8x8xf32>, vector<8x16xf32>, vector<8x16xf32> -> vector<8x16xf32>
    %58 = arith.addf %31, %57 : vector<8x16xf32>
    %c8_i32_32 = arith.constant 8 : i32
    %59 = vector.broadcast %c8_i32_32 : i32 to vector<1x16xi32>
    %60 = arith.cmpi sge, %30, %59 : vector<1x16xi32>
    %c16_i32 = arith.constant 16 : i32
    %61 = vector.broadcast %c16_i32 : i32 to vector<1x16xi32>
    %62 = arith.cmpi slt, %30, %61 : vector<1x16xi32>
    %63 = arith.andi %60, %62 : vector<1x16xi1>
    %64 = arith.extui %63 : vector<1x16xi1> to vector<1x16xi32>
    %65 = arith.sitofp %64 : vector<1x16xi32> to vector<1x16xf32>
    %66 = vector.broadcast %65 : vector<1x16xf32> to vector<8x16xf32>
    %67 = arith.mulf %13, %66 : vector<8x16xf32>
    %cst_33 = arith.constant dense<0.000000e+00> : vector<8x8xf32>
    %68 = tpu.matmul %67, %19, %cst_33 {dimension_numbers = #tpu.dot_dimension_numbers<[1], [1], [0], [0], [0, 0, 1, 0], [], []>} : vector<8x16xf32>, vector<8x16xf32>, vector<8x8xf32> -> vector<8x8xf32>
    %69 = arith.addf %68, %29 : vector<8x8xf32>
    %cst_34 = arith.constant dense<0xFF800000> : vector<8xf32>
    %70 = vector.multi_reduction <maximumf>, %69, %cst_34 [1] : vector<8x8xf32> to vector<8xf32>
    %71 = vector.shape_cast %70 : vector<8xf32> to vector<8x1xf32>
    %72 = vector.broadcast %71 : vector<8x1xf32> to vector<8x8xf32>
    %73 = arith.subf %69, %72 : vector<8x8xf32>
    %74 = math.exp %73 : vector<8x8xf32>
    %cst_35 = arith.constant dense<0.000000e+00> : vector<8xf32>
    %75 = vector.multi_reduction <add>, %74, %cst_35 [1] : vector<8x8xf32> to vector<8xf32>
    %76 = vector.shape_cast %75 : vector<8xf32> to vector<8x1xf32>
    %77 = tpu.reciprocal %76 {approx = true} : vector<8x1xf32> -> vector<8x1xf32>
    %78 = vector.broadcast %77 : vector<8x1xf32> to vector<8x8xf32>
    %79 = arith.mulf %74, %78 : vector<8x8xf32>
    %80 = arith.addf %54, %79 : vector<8x8xf32>
    %81 = vector.broadcast %65 : vector<1x16xf32> to vector<8x16xf32>
    %82 = arith.mulf %25, %81 : vector<8x16xf32>
    %cst_36 = arith.constant dense<0.000000e+00> : vector<8x16xf32>
    %83 = tpu.matmul %79, %82, %cst_36 {dimension_numbers = #tpu.dot_dimension_numbers<[1], [0], [0], [1], [0, 0, 1, 1], [], []>} : vector<8x8xf32>, vector<8x16xf32>, vector<8x16xf32> -> vector<8x16xf32>
    %84 = arith.addf %58, %83 : vector<8x16xf32>
    %c0_37 = arith.constant 0 : index
    %c0_38 = arith.constant 0 : index
    %85 = vector.load %arg9[%c0_37, %c0_38] : memref<16x16xf32, #tpu.memory_space<vmem>>, vector<16x16xf32>
    %cst_39 = arith.constant dense<0.000000e+00> : vector<8x16xf32>
    %86 = tpu.matmul %84, %85, %cst_39 {dimension_numbers = #tpu.dot_dimension_numbers<[1], [1], [0], [0], [0, 0, 1, 0], [], []>} : vector<8x16xf32>, vector<16x16xf32>, vector<8x16xf32> -> vector<8x16xf32>
    %c0_40 = arith.constant 0 : index
    %c0_41 = arith.constant 0 : index
    %87 = vector.load %arg13[%c0_40, %c0_41] : memref<1x16xf32, #tpu.memory_space<vmem>>, vector<1x16xf32>
    %88 = vector.broadcast %87 : vector<1x16xf32> to vector<8x16xf32>
    %89 = arith.addf %86, %88 : vector<8x16xf32>
    %90 = vector.extract_strided_slice %1 {offsets = [0, 16], sizes = [8, 16], strides = [1, 1]} : vector<8x32xf32> to vector<8x16xf32>
    %c0_42 = arith.constant 0 : index
    %c0_43 = arith.constant 0 : index
    %c0_44 = arith.constant 0 : index
    %91 = vector.load %arg5[%c0_42, %c0_43, %c0_44] : memref<1x8x1xf32, #tpu.memory_space<vmem>>, vector<1x8x1xf32>
    %92 = vector.shape_cast %91 : vector<1x8x1xf32> to vector<8x1xf32>
    %93 = vector.broadcast %92 : vector<8x1xf32> to vector<8x16xf32>
    %94 = arith.mulf %90, %93 : vector<8x16xf32>
    %95 = tpu.iota {dimensions = array<i32: 0>} : vector<8x1xi32>
    %cst_45 = arith.constant 0.000000e+00 : f32
    %96 = vector.broadcast %cst_45 : f32 to vector<8x16xf32>
    %c0_46 = arith.constant 0 : index
    %c0_47 = arith.constant 0 : index
    %97 = vector.load %arg14[%c0_46, %c0_47] : memref<3x16xf32, #tpu.memory_space<vmem>>, vector<1x16xf32>
    %c1_i32 = arith.constant 1 : i32
    %98 = tpu.dynamic_rotate %94 by %c1_i32 dim 0 : vector<8x16xf32>, i32 -> vector<8x16xf32>
    %c1_i32_48 = arith.constant 1 : i32
    %99 = vector.broadcast %c1_i32_48 : i32 to vector<8x1xi32>
    %100 = arith.cmpi sge, %95, %99 : vector<8x1xi32>
    %c7_i32 = arith.constant 7 : i32
    %101 = vector.broadcast %c7_i32 : i32 to vector<8x1xi32>
    %102 = arith.cmpi sle, %95, %101 : vector<8x1xi32>
    %103 = arith.andi %100, %102 : vector<8x1xi1>
    %cst_49 = arith.constant 0.000000e+00 : f32
    %104 = vector.shape_cast %103 : vector<8x1xi1> to vector<8x1xi1>
    %105 = vector.broadcast %104 : vector<8x1xi1> to vector<8x16xi1>
    %106 = vector.broadcast %cst_49 : f32 to vector<8x16xf32>
    %107 = arith.select %105, %98, %106 : vector<8x16xi1>, vector<8x16xf32>
    %108 = vector.broadcast %97 : vector<1x16xf32> to vector<8x16xf32>
    %109 = arith.mulf %108, %107 : vector<8x16xf32>
    %110 = arith.addf %96, %109 : vector<8x16xf32>
    %c1 = arith.constant 1 : index
    %c0_50 = arith.constant 0 : index
    %111 = vector.load %arg14[%c1, %c0_50] : memref<3x16xf32, #tpu.memory_space<vmem>>, vector<1x16xf32>
    %112 = vector.broadcast %111 : vector<1x16xf32> to vector<8x16xf32>
    %113 = arith.mulf %112, %94 : vector<8x16xf32>
    %114 = arith.addf %110, %113 : vector<8x16xf32>
    %c2 = arith.constant 2 : index
    %c0_51 = arith.constant 0 : index
    %115 = vector.load %arg14[%c2, %c0_51] : memref<3x16xf32, #tpu.memory_space<vmem>>, vector<1x16xf32>
    %c7_i32_52 = arith.constant 7 : i32
    %116 = tpu.dynamic_rotate %94 by %c7_i32_52 dim 0 : vector<8x16xf32>, i32 -> vector<8x16xf32>
    %c0_i32_53 = arith.constant 0 : i32
    %117 = vector.broadcast %c0_i32_53 : i32 to vector<8x1xi32>
    %118 = arith.cmpi sge, %95, %117 : vector<8x1xi32>
    %c6_i32 = arith.constant 6 : i32
    %119 = vector.broadcast %c6_i32 : i32 to vector<8x1xi32>
    %120 = arith.cmpi sle, %95, %119 : vector<8x1xi32>
    %121 = arith.andi %118, %120 : vector<8x1xi1>
    %cst_54 = arith.constant 0.000000e+00 : f32
    %122 = vector.shape_cast %121 : vector<8x1xi1> to vector<8x1xi1>
    %123 = vector.broadcast %122 : vector<8x1xi1> to vector<8x16xi1>
    %124 = vector.broadcast %cst_54 : f32 to vector<8x16xf32>
    %125 = arith.select %123, %116, %124 : vector<8x16xi1>, vector<8x16xf32>
    %126 = vector.broadcast %115 : vector<1x16xf32> to vector<8x16xf32>
    %127 = arith.mulf %126, %125 : vector<8x16xf32>
    %128 = arith.addf %114, %127 : vector<8x16xf32>
    %c0_55 = arith.constant 0 : index
    %c0_56 = arith.constant 0 : index
    %129 = vector.load %arg15[%c0_55, %c0_56] : memref<1x16xf32, #tpu.memory_space<vmem>>, vector<1x16xf32>
    %130 = vector.broadcast %129 : vector<1x16xf32> to vector<8x16xf32>
    %131 = arith.addf %128, %130 : vector<8x16xf32>
    %132 = tpu.concatenate %89, %131 in 1 : vector<8x16xf32>, vector<8x16xf32> -> vector<8x32xf32>
    %c0_57 = arith.constant 0 : index
    %c0_58 = arith.constant 0 : index
    %c0_59 = arith.constant 0 : index
    %133 = vector.load %arg16[%c0_57, %c0_58, %c0_59] : memref<1x8x32xf32, #tpu.memory_space<vmem>>, vector<1x8x32xf32>
    %134 = vector.shape_cast %133 : vector<1x8x32xf32> to vector<8x32xf32>
    %135 = vector.shape_cast %132 : vector<8x32xf32> to vector<1x8x32xf32>
    tpu.vector_store %arg16[%c0_57, %c0_58, %c0_59], %135 {strides = array<i32>} : memref<1x8x32xf32, #tpu.memory_space<vmem>>, vector<1x8x32xf32>,
    %cst_60 = arith.constant 5.000000e-01 : f32
    %136 = vector.broadcast %cst_60 : f32 to vector<8x8xf32>
    %137 = arith.mulf %80, %136 : vector<8x8xf32>
    %c0_61 = arith.constant 0 : index
    %c0_62 = arith.constant 0 : index
    %c0_63 = arith.constant 0 : index
    %138 = vector.load %arg17[%c0_61, %c0_62, %c0_63] : memref<1x8x8xf32, #tpu.memory_space<vmem>>, vector<1x8x8xf32>
    %139 = vector.shape_cast %138 : vector<1x8x8xf32> to vector<8x8xf32>
    %140 = vector.shape_cast %137 : vector<8x8xf32> to vector<1x8x8xf32>
    tpu.vector_store %arg17[%c0_61, %c0_62, %c0_63], %140 {strides = array<i32>} : memref<1x8x8xf32, #tpu.memory_space<vmem>>, vector<1x8x8xf32>,
    return
  }
  func.func @transform_0(%arg0: i32) -> (i32, i32, i32) {
    %c0_i32 = arith.constant 0 : i32
    %c0_i32_0 = arith.constant 0 : i32
    %c0_i32_1 = arith.constant 0 : i32
    return %arg0, %c0_i32, %c0_i32_0 : i32, i32, i32
  }
  func.func @transform_1(%arg0: i32) -> (i32, i32, i32) {
    %c0_i32 = arith.constant 0 : i32
    %c0_i32_0 = arith.constant 0 : i32
    %c0_i32_1 = arith.constant 0 : i32
    return %arg0, %c0_i32, %c0_i32_0 : i32, i32, i32
  }
  func.func @transform_2(%arg0: i32) -> (i32, i32, i32) {
    %c0_i32 = arith.constant 0 : i32
    %c0_i32_0 = arith.constant 0 : i32
    %c0_i32_1 = arith.constant 0 : i32
    return %arg0, %c0_i32, %c0_i32_0 : i32, i32, i32
  }
  func.func @transform_3(%arg0: i32) -> (i32, i32, i32) {
    %c0_i32 = arith.constant 0 : i32
    %c0_i32_0 = arith.constant 0 : i32
    %c0_i32_1 = arith.constant 0 : i32
    return %arg0, %c0_i32, %c0_i32_0 : i32, i32, i32
  }
  func.func @transform_4(%arg0: i32) -> (i32, i32, i32) {
    %c0_i32 = arith.constant 0 : i32
    %c0_i32_0 = arith.constant 0 : i32
    %c0_i32_1 = arith.constant 0 : i32
    return %arg0, %c0_i32, %c0_i32_0 : i32, i32, i32
  }
  func.func @transform_5(%arg0: i32) -> (i32, i32) {
    %c0_i32 = arith.constant 0 : i32
    %c0_i32_0 = arith.constant 0 : i32
    %c0_i32_1 = arith.constant 0 : i32
    return %c0_i32, %c0_i32_0 : i32, i32
  }
  func.func @transform_6(%arg0: i32) -> (i32, i32) {
    %c0_i32 = arith.constant 0 : i32
    %c0_i32_0 = arith.constant 0 : i32
    %c0_i32_1 = arith.constant 0 : i32
    return %c0_i32, %c0_i32_0 : i32, i32
  }
  func.func @transform_7(%arg0: i32) -> (i32, i32) {
    %c0_i32 = arith.constant 0 : i32
    %c0_i32_0 = arith.constant 0 : i32
    %c0_i32_1 = arith.constant 0 : i32
    return %c0_i32, %c0_i32_0 : i32, i32
  }
  func.func @transform_8(%arg0: i32) -> (i32, i32) {
    %c0_i32 = arith.constant 0 : i32
    %c0_i32_0 = arith.constant 0 : i32
    %c0_i32_1 = arith.constant 0 : i32
    return %c0_i32, %c0_i32_0 : i32, i32
  }
  func.func @transform_9(%arg0: i32) -> (i32, i32) {
    %c0_i32 = arith.constant 0 : i32
    %c0_i32_0 = arith.constant 0 : i32
    %c0_i32_1 = arith.constant 0 : i32
    return %c0_i32, %c0_i32_0 : i32, i32
  }
  func.func @transform_10(%arg0: i32) -> (i32, i32) {
    %c0_i32 = arith.constant 0 : i32
    %c0_i32_0 = arith.constant 0 : i32
    %c0_i32_1 = arith.constant 0 : i32
    return %c0_i32, %c0_i32_0 : i32, i32
  }
  func.func @transform_11(%arg0: i32) -> (i32, i32) {
    %c0_i32 = arith.constant 0 : i32
    %c0_i32_0 = arith.constant 0 : i32
    %c0_i32_1 = arith.constant 0 : i32
    return %c0_i32, %c0_i32_0 : i32, i32
  }
  func.func @transform_12(%arg0: i32) -> (i32, i32) {
    %c0_i32 = arith.constant 0 : i32
    %c0_i32_0 = arith.constant 0 : i32
    %c0_i32_1 = arith.constant 0 : i32
    return %c0_i32, %c0_i32_0 : i32, i32
  }
  func.func @transform_13(%arg0: i32) -> (i32, i32) {
    %c0_i32 = arith.constant 0 : i32
    %c0_i32_0 = arith.constant 0 : i32
    %c0_i32_1 = arith.constant 0 : i32
    return %c0_i32, %c0_i32_0 : i32, i32
  }
  func.func @transform_14(%arg0: i32) -> (i32, i32) {
    %c0_i32 = arith.constant 0 : i32
    %c0_i32_0 = arith.constant 0 : i32
    %c0_i32_1 = arith.constant 0 : i32
    return %c0_i32, %c0_i32_0 : i32, i32
  }
  func.func @transform_15(%arg0: i32) -> (i32, i32, i32) {
    %c0_i32 = arith.constant 0 : i32
    %c0_i32_0 = arith.constant 0 : i32
    %c0_i32_1 = arith.constant 0 : i32
    return %arg0, %c0_i32, %c0_i32_0 : i32, i32, i32
  }
  func.func @transform_16(%arg0: i32) -> (i32, i32, i32) {
    %c0_i32 = arith.constant 0 : i32
    %c0_i32_0 = arith.constant 0 : i32
    %c0_i32_1 = arith.constant 0 : i32
    return %arg0, %c0_i32, %c0_i32_0 : i32, i32, i32
  }
}

</mosaic_0001>

<bundles_post_ra>
// kernel: tpu_custom_call.1
= control target key start
LH: loop header
LB: loop body
LE: loop exit
PB: predicated region body
PF: predicated region fallthrough
CT: control target
= control target key end

     0   :  { %s2131_s0 = inlined_call_operand.vmem [shape: f32[2,8,32], index: 0, kind: input, shape index: {}]   ;;  %s2132_s1 = inlined_call_operand.hbm [shape: f32[2,8,32], index: 1, kind: input, shape index: {}]   ;;  %s2133_s2 = inlined_call_operand.hbm [shape: f32[2,8,32], index: 2, kind: input, shape index: {}]   ;;  %s2134_s3 = inlined_call_operand.vmem [shape: f32[2,1,8], index: 3, kind: input, shape index: {}]   ;;  %s2135_s4 = inlined_call_operand.vmem [shape: f32[2,8,1], index: 4, kind: input, shape index: {}]   ;;  %s2136_s5 = inlined_call_operand.hbm [shape: f32[16,16], index: 5, kind: input, shape index: {}]   ;;  %s2137_s6 = inlined_call_operand.hbm [shape: f32[16,16], index: 6, kind: input, shape index: {}]   ;;  %s2138_s7 = inlined_call_operand.hbm [shape: f32[16,16], index: 7, kind: input, shape index: {}]   ;;  %s2139_s8 = inlined_call_operand.hbm [shape: f32[16,16], index: 8, kind: input, shape index: {}]   ;;  %s2140_s9 = inlined_call_operand.vmem [shape: f32[1,16], index: 9, kind: input, shape index: {}]   ;;  %s2141_s10 = inlined_call_operand.vmem [shape: f32[1,16], index: 10, kind: input, shape index: {}]   ;;  %s2142_s11 = inlined_call_operand.vmem [shape: f32[1,16], index: 11, kind: input, shape index: {}]   ;;  %s2143_s12 = inlined_call_operand.vmem [shape: f32[1,16], index: 12, kind: input, shape index: {}]   ;;  %s2144_s13 = inlined_call_operand.vmem [shape: f32[3,16], index: 13, kind: input, shape index: {}]   ;;  %s2145_s14 = inlined_call_operand.vmem [shape: f32[1,16], index: 14, kind: input, shape index: {}]   ;;  %s2146_s15 = inlined_call_operand.hbm [shape: f32[2,8,32], index: 15, kind: output, shape index: {0}]   ;;  %s2147_s16 = inlined_call_operand.hbm [shape: f32[2,8,8], index: 16, kind: output, shape index: {1}]  }
   0x1   :  { %2158 = sst [smem:[#allocation30_spill]] %s2131_s0 }
   0x2   :  { %2159 = sst [smem:[#allocation31_spill]] %s2136_s5 }
   0x3   :  { %2160 = sst [smem:[#allocation32_spill]] %s2137_s6 }
   0x4   :  { %2161 = sst [smem:[#allocation33_spill]] %s2138_s7 }
   0x5   :  { %2162 = sst [smem:[#allocation34_spill]] %s2139_s8 }
   0x6   :  { %2163 = sst [smem:[#allocation35_spill]] %s2143_s12 }
   0x7   :  { %2164 = sst [smem:[#allocation36_spill]] %s2146_s15 }
   0x8   :  { %2165 = sst [smem:[#allocation37_spill]] %s2147_s16 }
   0x9   :  { %22 = vsyncpa [#allocation3], 0 }
   0xa   :  { %24 = vsyncpa [#allocation3 + $0x1], 0 }
   0xb   :  { %25 = vsyncpa [#allocation6], 0 }
   0xc   :  { %27 = vsyncpa [#allocation6 + $0x1], 0 }
   0xd   :  { %28 = vsyncpa [#allocation9], 0 }
   0xe   :  { %29 = vsyncpa [#allocation12], 0 }
   0xf   :  { %30 = vsyncpa [#allocation4], 0 }
  0x10   :  { %32 = vsyncpa [#allocation4 + $0x1], 0 }
  0x11   :  { %33 = vsyncpa [#allocation15], 0 }
  0x12   :  { %35 = vsyncpa [#allocation15 + $0x1], 0  ;;  %s1834_s21 = smov 0   ;;  %s1836_s22 = smov 0  }
  0x13   :  { %s1838_s23 = smov 0   ;;  %s1840_s24 = smov 0  }
  0x14 LB: > { %2166 = sst [smem:[#allocation23_spill]] %s1725_s21  ;;  %s1858_s28 = sadd.s32 4294967295, %s1737_s24   ;;  %s1737_s24 = sphi %s1840_s24, %s2194_s24   ;;  %s1733_s23 = sphi %s1838_s23, %s2196_s23   ;;  %s1729_s22 = sphi %s1836_s22, %s2198_s22   ;;  %s1725_s21 = sphi %s1834_s21, %s2197_s21  }
  0x15   : > { %2167 = sst [smem:[#allocation24_spill]] %s1733_s23  ;;  %p1274_p0 = scmp.ge.s32.totalorder %s1737_s24, 1 }
  0x16   : > { %2168 = sst [smem:[#allocation25_spill]] %s1737_s24  ;;  %p88_p1 = scmp.eq.s32.totalorder %s1858_s28, 0 }
  0x17   : > { %s2169_s5 = sld [smem:[#allocation31_spill]]  ;;  %p438_p2 = scmp.lt.s32.totalorder %s1737_s24, 3 }
  0x18   : > { %s1739_s30 = smov [#allocation7]   ;;  %s2171_s6 = sld [smem:[#allocation32_spill]] }
  0x19   : > { %p1863_p3 = pnand %p1274_p0, %p438_p2  ;;  %s451_s0 = sshll.u32 %s1739_s30, 4  ;;  %s452_s0 = int_to_ptr.vmem [resolvable:$true] %s451_s0 }
  0x1a   : > { %s2173_s7 = sld [smem:[#allocation33_spill]]  ;;  %s1741_s15 = smov 128  }
  0x1b   : > { %p1345_p4 = pneg %p1863_p3  ;;  %s1742_s17 = smov 8  }
  0x1c   : > { %s2174_s8 = sld [smem:[#allocation34_spill]]  ;;  %s74_s18 = sadd.s32 1, %s1733_s23 }
  0x1d   : > { %s449_s27 = sshll.u32 %s2169_s5, 4  ;;  %p1875_p6 = pnand %p1345_p4, %p88_p1  ;;  %s450_s27 = int_to_ptr.hbm [resolvable:$true] %s449_s27 }
  0x1e   : > { %s463_s19 = sshll.u32 %s2171_s6, 4  ;;  %s1740_s5 = smov [#allocation8]   ;;  %s464_s19 = int_to_ptr.hbm [resolvable:$true] %s463_s19 }
  0x1f   : > { %s465_s12 = sshll.u32 %s1740_s5, 4  ;;  %s1743_s5 = smov [#allocation10]   ;;  %s466_s12 = int_to_ptr.vmem [resolvable:$true] %s465_s12 }
  0x20   : > { %s477_s30 = sshll.u32 %s2173_s7, 4  ;;  %s479_s26 = sshll.u32 %s1743_s5, 4  ;;  %s478_s30 = int_to_ptr.hbm [resolvable:$true] %s477_s30  ;;  %s480_s26 = int_to_ptr.vmem [resolvable:$true] %s479_s26 }
  0x21   : > { %1348 = dma.hbm_to_vmem [thread:$0]  (!%p1875_p6), %s450_s27, 256, %s452_s0, [#allocation6], %s1741_s15, %s1741_s15, %s1742_s17  }
  0x22   : > { %1351 = dma.hbm_to_vmem [thread:$0]  (!%p1875_p6), %s464_s19, 256, %s466_s12, [#allocation9], %s1741_s15, %s1741_s15, %s1742_s17  }
  0x23   : > { %s491_s25 = sshll.u32 %s2174_s8, 4  ;;  %s1744_s27 = smov [#allocation11]   ;;  %s492_s25 = int_to_ptr.hbm [resolvable:$true] %s491_s25 }
  0x24   : > { %1354 = dma.hbm_to_vmem [thread:$0]  (!%p1875_p6), %s478_s30, 256, %s480_s26, [#allocation9], %s1741_s15, %s1741_s15, %s1742_s17  }
  0x25   : > { %s493_s12 = sshll.u32 %s1744_s27, 4  ;;  %s1273_s6 = sadd.s32 4294967294, %s1737_s24   ;;  %s494_s12 = int_to_ptr.vmem [resolvable:$true] %s493_s12 }
  0x26   : > { %1357 = dma.hbm_to_vmem [thread:$0]  (!%p1875_p6), %s492_s25, 256, %s494_s12, [#allocation12], %s1741_s15, %s1741_s15, %s1742_s17  }
  0x27   : > { %s1895_s0 = sadd.s32 1, %s1737_s24   ;;  %p81_p8 = scmp.ne.s32.totalorder %s1733_s23, %s1729_s22 }
  0x28   : > { %2175 = sst [smem:[#allocation26_spill]] %s1895_s0  ;;  %s71_s19 = ssub.s32 %s1737_s24, %s1895_s0 }
  0x29   : > { %p72_p7 = scmp.eq.s32.totalorder %s71_s19, 0  ;;  %p82_p9 = scmp.eq.s32.totalorder %s1737_s24, 0 }
  0x2a   : > { %p87_p10 = scmp.ne.s32.totalorder %s1729_s22, %s1725_s21  ;;  %p399_p13 = scmp.eq.s32.totalorder %s1858_s28, 1 }
  0x2b   : > { %s1906_s30 = scalar_select %p72_p7, %s1733_s23, %s74_s18  }
  0x2c   : > { %p1908_p11 = por %p82_p9, %p81_p8  ;;  %p1914_p12 = por %p88_p1, %p87_p10 }
  0x2d   : > { %2176 = sst [smem:[#allocation27_spill]] %s1906_s30  ;;  %p405_p0 = scmp.eq.s32.totalorder %s1273_s6, 1 }
  0x2e   : > { %p1376_p2 = scmp.lt.s32.totalorder %s1737_s24, 2  ;;  %s532_s20 = sand.u32 1, %s1733_s23  }
  0x2f   : > { %p1921_p4 = por %p399_p13, %p81_p8  ;;  %p1925_p6 = por %p405_p0, %p87_p10 }
  0x30   : > { %s1929_s26 = sshll.u32 %s532_s20, 3  ;;  %s1281_s27 = sshll.u32 %s1737_s24, 3 }
  0x31   : > { %s2179_s17 = scalar_select %p1921_p4, 1, 0 }
  0x32   : > { %s2181_s25 = scalar_select %p1925_p6, 1, 0 }
  0x33   : > { %2180 = sst [smem:[#allocation28_spill]] %s2179_s17  ;;  %s540_s18 = scalar_lea.hbm %s2132_s1, %s1281_s27 }
  0x34   : > { %2182 = sst [smem:[#allocation29_spill]] %s2181_s25  ;;  %s536_s7 = scalar_lea.vmem [#allocation2], %s1929_s26 }
  0x35   : > { %s544_s6 = sshll.u32 %s536_s7, 4  ;;  %s542_s8 = sshll.u32 %s540_s18, 4  ;;  %s545_s6 = int_to_ptr.vmem [resolvable:$true] %s544_s6  ;;  %s543_s8 = int_to_ptr.hbm [resolvable:$true] %s542_s8 }
  0x36   : > { %p1938_p7 = pnand %p1376_p2, %p1908_p11  ;;  %s559_s25 = scalar_lea.hbm %s2133_s2, %s1281_s27 }
  0x37   : > { %s551_s21 = sand.u32 1, %s1737_s24   ;;  %s533_s16 = scalar_lea.sflag [#allocation3], %s532_s20 }
  0x38   : > { %s1563_s12 = sshra.s32 %s543_s8, 4  ;;  %p1567_p9 = pneg %p1938_p7  ;;  %s1564_s12 = int_to_ptr.hbm [resolvable:$true] %s1563_s12 }
  0x39   : > { %s1565_s19 = scalar_lea.hbm %s1564_s12, 8  ;;  %s1570_s18 = scalar_lea.hbm %s2132_s1, 16 }
  0x3a   : > { %p1566_p8 = scmp.ne.s32.totalorder %s1564_s12, %s1565_s19  ;;  %p1571_p13 = scmp.lt.s32.totalorder %s1564_s12, %s2132_s1 }
  0x3b   : > { %p1572_p0 = scmp.lt.s32.totalorder %s1570_s18, %s1565_s19 }
  0x3c   : > { %p1568_p10 = pnand %p1567_p9, %p1566_p8 }
  0x3d   : > { %p1573_p2 = por %p1572_p0, %p1571_p13 }
  0x3e   : > { %p1569_p11 = pneg %p1568_p10 }
  0x40   : > { %p1574_p5 = pnand %p1573_p2, %p1569_p11 }
  0x42   : > { %1577 = shalt.err (!%p1574_p5)
}
  0x43   : > { %1361 = dma.hbm_to_vmem [thread:$0]  (!%p1938_p7), %s543_s8, 128, %s545_s6, %s533_s16  }
  0x44   : > { %s561_s20 = sshll.u32 %s559_s25, 4  ;;  %s555_s27 = scalar_lea.vmem [#allocation5], %s1929_s26  ;;  %s562_s20 = int_to_ptr.hbm [resolvable:$true] %s561_s20 }
  0x45   : > { %s563_s24 = sshll.u32 %s555_s27, 4  ;;  %s552_s7 = scalar_lea.sflag [#allocation6], %s551_s21  ;;  %s564_s24 = int_to_ptr.vmem [resolvable:$true] %s563_s24 }
  0x46   : > { %s1593_s5 = sshra.s32 %s562_s20, 4  ;;  %s1600_s18 = scalar_lea.hbm %s2133_s2, 16  ;;  %s1594_s5 = int_to_ptr.hbm [resolvable:$true] %s1593_s5 }
  0x47   : > { %s1595_s17 = scalar_lea.hbm %s1594_s5, 8  ;;  %p1601_p5 = scmp.lt.s32.totalorder %s1594_s5, %s2133_s2 }
  0x48   : > { %p1596_p8 = scmp.ne.s32.totalorder %s1594_s5, %s1595_s17  ;;  %p1602_p13 = scmp.lt.s32.totalorder %s1600_s18, %s1595_s17 }
  0x4a   : > { %p1598_p10 = pnand %p1596_p8, %p1567_p9  ;;  %p1603_p0 = por %p1602_p13, %p1601_p5 }
  0x4c   : > { %p1599_p11 = pneg %p1598_p10 }
  0x4e   : > { %p1604_p2 = pnand %p1603_p0, %p1599_p11 }
  0x50   : > { %1607 = shalt.err (!%p1604_p2)
}
  0x51   : > { %1364 = dma.hbm_to_vmem [thread:$0]  (!%p1938_p7), %s562_s20, 128, %s564_s24, %s552_s7  }
  0x52   : > { %585 = sbr.rel (%p1863_p3) target bundleno = 900 (0x384), region = 80  ;;  %s1974_s16 = sand.u32 (!%p1863_p3), 1, %s1729_s22  }
  0x53   : > { %s1977_s21 = sshll.u32 (!%p1863_p3), %s1974_s16, 3  ;;  %s588_s25 = scalar_lea.sflag (!%p1863_p3), [#allocation3], %s1974_s16 }
  0x54   : > { %s591_s17 = scalar_lea.vmem (!%p1863_p3), [#allocation2], %s1977_s21 }
  0x57   : > { %1696 = dma.done.wait (%p1914_p12), %s588_s25, 128  }
  0x58   : > { %1698 = vsyncadd (%p1914_p12), %s588_s25, 4294967168  ;;  %s597_s24 = sand.u32 1, %s1858_s28   ;;  %s601_s30 = scalar_lea.vmem [#allocation5], %s1977_s21 }
  0x59   : > { %s598_s29 = scalar_lea.sflag [#allocation6], %s597_s24 }
  0x5a   : > { %1700 = dma.done.wait (%p1914_p12), %s598_s29, 128  }
  0x5b   : > { %1702 = vsyncadd (%p1914_p12), %s598_s29, 4294967168 }
  0x5c   : > { %1704 = dma.done.wait (%p88_p1), [#allocation6], 256  }
  0x5d   : > { %1706 = vsyncadd (%p88_p1), [#allocation6], 4294967040 }
  0x5e   : > { %1708 = dma.done.wait (%p88_p1), [#allocation9], 512  }
  0x5f   : > { %1710 = vsyncadd (%p88_p1), [#allocation9], 4294966784 }
  0x60   : > { %1712 = dma.done.wait (%p88_p1), [#allocation12], 256  }
  0x61   : > { %1714 = vsyncadd (%p88_p1), [#allocation12], 4294967040  ;;  %p692_p3 = scmp.lt.s32.totalorder %s1858_s28, 1  ;;  %vm712_vm0 = vcmask 130048   ;;  %v707_v0 = vld [vmem:[#allocation7 + $0x8] sm:$0xff]  ;;  %v744_v1 = vld [vmem:[#allocation8 + $0x8] sm:$0xff]  ;;  %v817_v6 = vlaneseq }
  0x62   : > { %1295 = vmatpush.xpose.msk.msra.mxu0 %vm712_vm0, %v707_v0  ;;  %1298 = vmatpush.xpose.msk.msra.mxu1 %vm712_vm0, %v744_v1  ;;  %v706_v2 = vld [vmem:[#allocation7] sm:$0xff]  ;;  %v743_v3 = vld [vmem:[#allocation8] sm:$0xff]  ;;  %s2184_s20 = sld [smem:[#allocation30_spill]]  ;;  %v1745_v14 = vmov 0.0   ;;  %v779_v20 = vld [vmem:[#allocation10 + $0x8] sm:$0xff]  ;;  %vm851_vm5 = vcmask 64512  }
  0x63   : > { %s2005_s15 = scalar_select %p692_p3, %s1858_s28, 1  ;;  %v704_v5 = vld [vmem:[%s591_s17] sm:$0xff]  ;;  %v818_v7 = vand.u32 127, %v817_v6  ;;  %1301 = vmatpush.xpose.msk.msra.mxu2 %vm712_vm0, %v779_v20  ;;  %v705_v29 = vld [vmem:[%s601_s30] sm:$0xff]  ;;  %v1746_v31 = vmov 0   ;;  %v996_v59 = vshrl.u32 %v817_v6, 7 }
  0x64   : > { %v1426_v8 = vld [vmem:[%s2140_s9] ss:$0 sm:$0xff]  ;;  %1424 = vset.pattern.permute.xlu2 %v1746_v31  ;;  %1425 = vset.pattern.permute.xlu0 %v1746_v31  ;;  %v954_v57 = vld [vmem:[#allocation11 + $0x8] sm:$0xff]  ;;  %v953_v58 = vld [vmem:[#allocation11] sm:$0xff]  ;;  %s1748_s18 = smov 16   ;;  %s1317_s8 = sshll.u32 %s1858_s28, 3 }
  0x65   : > { %s1293_s26 = sshll.u32 %s2005_s15, 3  ;;  %s698_s12 = scalar_lea.vmem %s2134_s3, %s2005_s15  ;;  %v1427_v9 = vld [vmem:[%s2141_s10] ss:$0 sm:$0xff]  ;;  %vm820_vm1 = vcmp.lt.s32.totalorder %v818_v7, 8  ;;  %vm865_vm2 = vcmp.ge.s32.totalorder %v818_v7, 8  ;;  %vm866_vm3 = vcmp.lt.s32.totalorder %v818_v7, 16 }
  0x66   : > { %1296 = vmatpush.xpose.msk.msra.mxu0 %vm712_vm0, %v706_v2  ;;  %1299 = vmatpush.xpose.msk.msra.mxu1 %vm712_vm0, %v743_v3  ;;  %v1304_v15 = vsel %vm820_vm1, 1.0, %v1745_v14  ;;  %vm867_vm4 = vmand %vm865_vm2, %vm866_vm3  ;;  %v778_v21 = vld [vmem:[#allocation10] sm:$0xff]  ;;  %s702_s24 = scalar_lea.vmem %s2135_s4, %s1293_s26  ;;  %s1747_s15 = smov 112   ;;  %vm1003_vm6 = vcmp.ge.s32.totalorder %v996_v59, 1  ;;  %vm1019_vm7 = vcmp.le.s32.totalorder %v996_v59, 6 }
  0x67   : > { %v1307_v18 = vsel %vm867_vm4, 1.0, %v1745_v14  ;;  %1302 = vmatpush.xpose.msk.msra.mxu2 %vm712_vm0, %v778_v21  ;;  %v1428_v22 = vld [vmem:[%s698_s12] ss:$0 sm:$0xff]  ;;  %v1431_v61 = vld [vmem:[%s2144_s13 + $0x1] ss:$0 sm:$0xff]  ;;  %s1047_s0 = scalar_lea.sflag [#allocation15], %s1974_s16 }
  0x68   : > { %s695_s27 = scalar_lea.vmem %s2184_s20, %s1293_s26  ;;  %v988_v30 = vld [vmem:[%s702_s24] sm:$0xff]  ;;  %s691_s26 = scalar_lea.vmem [#allocation14], %s1977_s21 }
  0x69   : > { %v2017_v4 = vld [vmem:[%s695_s27] sm:$0xff]  ;;  %1300 = vmatmul.msk.f32.vlgmr.msra.gmra.mxu1 %vm712_vm0, %v704_v5  ;;  %991 = vperm.xlu2 %1424, %v988_v30   ;;  %s2186_s24 = sld [smem:[#allocation37_spill]] }
  0x6a   : > { %1297 = vmatmul.msk.f32.vlgmr.msra.gmra.mxu0 %vm712_vm0, %v2017_v4  ;;  %1303 = vmatmul.msk.f32.vlgmr.msra.gmra.mxu2 %vm712_vm0, %v705_v29  ;;  %v1429_v42 = vld [vmem:[%s2142_s11] ss:$0 sm:$0xff]  ;;  %v1432_v63 = vld [vmem:[%s2144_s13 + $0x2] ss:$0 sm:$0xff] }
  0x6b   : > { %1312 = vmatpush.xpose.msk.msrb.mxu2 %vm712_vm0, %v954_v57  ;;  %v1430_v60 = vld [vmem:[%s2144_s13] ss:$0 sm:$0xff] }
  0x6f   : > { %1313 = vmatpush.xpose.msk.msrb.mxu2 %vm712_vm0, %v953_v58  ;;  %s2187_s29 = smov %s2186_s24  ;;  %s1071_s30 = scalar_lea.hbm %s2186_s24, %s1317_s8 }
  0x70   : > { %s1075_s6 = sshll.u32 %s1071_s30, 4  ;;  %s1643_s28 = scalar_lea.hbm %s2187_s29, 16  ;;  %s1076_s6 = int_to_ptr.hbm [resolvable:$true] %s1075_s6 }
  0x71   : > { %s1637_s20 = sshra.s32 %s1076_s6, 4  ;;  %s1638_s20 = int_to_ptr.hbm [resolvable:$true] %s1637_s20 }
  0x72   : > { %s1639_s27 = scalar_lea.hbm %s1638_s20, 8  ;;  %p1644_p9 = scmp.lt.s32.totalorder %s1638_s20, %s2187_s29 }
  0x73   : > { %p1640_p1 = scmp.ne.s32.totalorder %s1638_s20, %s1639_s27  ;;  %p1645_p8 = scmp.lt.s32.totalorder %s1643_s28, %s1639_s27 }
  0x75   : > { %p1641_p12 = pnand %p1640_p1, %p1921_p4  ;;  %p1646_p10 = por %p1645_p8, %p1644_p9 }
  0x77   : > { %p1642_p7 = pneg %p1641_p12 }
  0x79   : > { %p1647_p11 = pnand %p1646_p10, %p1642_p7 }
  0xc3   : > { %v992_v47 = vpop.permute.xlu2 %991 }
  0xc4   : > { %v994_v48 = vmul.f32 %v992_v47, %v2017_v4 }
  0xc6   : > { %999 = vrot.lane.b32.xlu2 %v994_v48, %s1747_s15  ;;  %s1073_s15 = sshll.u32 %s691_s26, 4  ;;  %s1074_s15 = int_to_ptr.vmem [resolvable:$true] %s1073_s15 }
  0xe6   : > { %v775_v11 = vpop.f32.mrf.mxu1 }
  0xe7   : > { %v739_v10 = vpop.f32.mrf.mxu0  ;;  %v776_v13 = vadd.f32 %v1427_v9, %v775_v11 }
  0xe8   : > { %v740_v12 = vadd.f32 %v1426_v8, %v739_v10  ;;  %v1433_v8 = vld [vmem:[%s2145_s14] ss:$0 sm:$0xff] }
  0xe9   : > { %1305 = vmatpush.xpose.msk.msra.mxu3 %vm712_vm0, %v776_v13 }
  0xea   : > { %v742_v16 = vmul.f32 0.35355338, %v740_v12 }
  0xec   : > { %v824_v17 = vmul.f32 %v1304_v15, %v742_v16  ;;  %v870_v19 = vmul.f32 %v1307_v18, %v742_v16 }
  0xed   : > { %1308 = vmatpush.xpose.msk.msrb.mxu3 %vm712_vm0, %v776_v13  ;;  %v810_v43 = vpop.f32.mrf.mxu2 }
  0xee   : > { %1306 = vmatmul.msk.f32.vlgmr.msra.gmra.mxu3 %vm712_vm0, %v824_v17  ;;  %v811_v44 = vadd.f32 %v1429_v42, %v810_v43 }
  0xf0   : > { %v864_v45 = vmul.f32 %v1304_v15, %v811_v44  ;;  %v906_v46 = vmul.f32 %v1307_v18, %v811_v44 }
  0xf2   : > { %948 = vmatpush.msrb.mxu1 %v864_v45  ;;  %925 = vmatpush.msrb.mxu0 %v906_v46 }
  0xf6   : > { %1309 = vmatmul.msk.f32.vlgmr.msrb.gmra.mxu3 %vm712_vm0, %v870_v19 }
 0x120   : > { %v1000_v62 = vpop.permute.xlu2 %999 }
 0x121   : > { %v1002_v0 = vrot.slane %v1000_v62, 7  ;;  %v1017_v1 = vrot.slane %v1000_v62, 1  ;;  %v1014_v2 = vmul.f32 %v1431_v61, %v1000_v62 }
 0x123   : > { %v1008_v3 = vsel %vm1003_vm6, %v1002_v0, 0.0  ;;  %v1023_v4 = vsel %vm1019_vm7, %v1017_v1, 0.0 }
 0x124   : > { %v1010_v5 = vmul.f32 %v1430_v60, %v1008_v3  ;;  %v1025_v6 = vmul.f32 %v1432_v63, %v1023_v4 }
 0x126   : > { %v1015_v7 = vadd.f32 %v1014_v2, %v1010_v5 }
 0x128   : > { %v1026_v9 = vadd.f32 %v1025_v6, %v1015_v7 }
 0x12a   : > { %v1031_v10 = vadd.f32 %v1433_v8, %v1026_v9 }
 0x171   : > { %v848_v23 = vpop.f32.mrf.mxu3 }
 0x172   : > { %v849_v24 = vadd.f32 %v1428_v22, %v848_v23 }
 0x174   : > { %v852_v25 = vsel %vm851_vm5, %v849_v24, -inf }
 0x175   : > { %853 = vmax.xlane.f32.xlu0 %v852_v25 }
 0x179   : > { %v891_v26 = vpop.f32.mrf.mxu3 }
 0x17a   : > { %v892_v27 = vadd.f32 %v1428_v22, %v891_v26 }
 0x17c   : > { %v894_v28 = vsel %vm851_vm5, %v892_v27, -inf }
 0x17d   : > { %895 = vmax.xlane.f32.xlu0 %v894_v28 }
 0x191   : > { %1033 = vrot.lane.b32.xlu0 %v1031_v10, %s1748_s18 }
 0x1e8   : > { %v854_v32 = vpop.xlane.xlu0 %853 }
 0x1e9   : > { %v855_v33 = vsub.f32 %v849_v24, %v854_v32 }
 0x1eb   : > { %v856_v34 = vmul.f32 1.442695, %v855_v33 }
 0x1ed   : > { %1435 = vpow2.f32 %v856_v34 }
 0x1f0   : > { %v896_v35 = vpop.xlane.xlu0 %895 }
 0x1f1   : > { %v897_v36 = vsub.f32 %v892_v27, %v896_v35 }
 0x1f3   : > { %v1436_v37 = vpop.eup %1435  ;;  %v898_v38 = vmul.f32 1.442695, %v897_v36 }
 0x1f4   : > { %v858_v39 = vsel %vm851_vm5, %v1436_v37, 0.0 }
 0x1f5   : > { %1437 = vpow2.f32 %v898_v38  ;;  %859 = vadd.xlane.f32.xlu1 %v858_v39 }
 0x1fb   : > { %v1438_v40 = vpop.eup %1437 }
 0x1fc   : > { %v900_v41 = vsel %vm851_vm5, %v1438_v40, 0.0 }
 0x1fd   : > { %901 = vadd.xlane.f32.xlu1 %v900_v41 }
 0x268   : > { %v860_v49 = vpop.xlane.xlu1 %859 }
 0x269   : > { %1439 = vrcp.f32 %v860_v49 }
 0x26f   : > { %v1440_v50 = vpop.eup %1439 }
 0x270   : > { %v902_v51 = vpop.xlane.xlu1 %901  ;;  %v862_v52 = vmul.f32 %v1440_v50, %v1436_v37 }
 0x271   : > { %1441 = vrcp.f32 %v902_v51 }
 0x272   : > { %1311 = vmatmul.msk.f32.vlgmr.msrb.gmra.mxu1 %vm851_vm5, %v862_v52 }
 0x277   : > { %v1442_v53 = vpop.eup %1441 }
 0x278   : > { %v904_v54 = vmul.f32 %v1442_v53, %v1438_v40 }
 0x27a   : > { %v905_v55 = vadd.f32 %v904_v54, %v862_v52  ;;  %1310 = vmatmul.msk.f32.vlgmr.msrb.gmra.mxu0 %vm851_vm5, %v904_v54 }
 0x27c   : > { %v1039_v56 = vmul.f32 0.5, %v905_v55 }
 0x27e   : > { %1040 = vst.msk [vmem:[%s691_s26] sm:$0xff] %vm851_vm5, %v1039_v56 }
 0x2ef   : > { %v950_v11 = vpop.f32.mrf.mxu1 }
 0x2f7   : > { %v927_v12 = vpop.f32.mrf.mxu0 }
 0x2f8   : > { %v951_v13 = vadd.f32 %v950_v11, %v927_v12 }
 0x2fa   : > { %1314 = vmatmul.msk.f32.vlgmr.msrb.gmra.mxu2 %vm712_vm0, %v951_v13 }
 0x2fb   : > { %1650 = shalt.err (!%p1647_p11)
}
 0x2fc   : > { %1342 = dma.vmem_to_hbm [thread:$0]  (%p1921_p4), %s1074_s15, 128, %s1076_s6, %s1047_s0   ;;  %vm1037_vm8 = vcmask 261120   ;;  %v1034_v17 = vpop.permute.xlu0 %1033 }
 0x2fd   : > { %s2188_s25 = sld [smem:[#allocation36_spill]]  ;;  %s684_s5 = scalar_lea.vmem [#allocation13], %s1977_s21 }
 0x2fe   : > { %s2189_s7 = sld [smem:[#allocation35_spill]]  ;;  %s1059_s20 = sshll.u32 %s684_s5, 4  ;;  %s1060_s20 = int_to_ptr.vmem [resolvable:$true] %s1059_s20 }
 0x2ff   : > { %s1042_s15 = scalar_lea.sflag [#allocation4], %s1974_s16 }
 0x303   : > { %s1057_s17 = scalar_lea.hbm %s2188_s25, %s1317_s8  ;;  %s1671_s28 = scalar_lea.hbm %s2188_s25, 16 }
 0x304   : > { %v1434_v14 = vld [vmem:[%s2189_s7] ss:$0 sm:$0xff]  ;;  %s1061_s27 = sshll.u32 %s1057_s17, 4  ;;  %s1062_s27 = int_to_ptr.hbm [resolvable:$true] %s1061_s27 }
 0x305   : > { %s1665_s6 = sshra.s32 %s1062_s27, 4  ;;  %s1666_s6 = int_to_ptr.hbm [resolvable:$true] %s1665_s6 }
 0x306   : > { %s1667_s8 = scalar_lea.hbm %s1666_s6, 8  ;;  %p1672_p2 = scmp.lt.s32.totalorder %s1666_s6, %s2188_s25 }
 0x307   : > { %p1668_p5 = scmp.ne.s32.totalorder %s1666_s6, %s1667_s8  ;;  %p1673_p3 = scmp.lt.s32.totalorder %s1671_s28, %s1667_s8 }
 0x309   : > { %p1669_p13 = pnand %p1668_p5, %p1921_p4  ;;  %p1674_p1 = por %p1673_p3, %p1672_p2 }
 0x30b   : > { %p1670_p0 = pneg %p1669_p13 }
 0x30d   : > { %p1675_p12 = pnand %p1674_p1, %p1670_p0 }
 0x37d   : > { %v985_v15 = vpop.f32.mrf.mxu2 }
 0x37e   : > { %v986_v16 = vadd.f32 %v1434_v14, %v985_v15 }
 0x380   : > { %v1036_v18 = vsel %vm712_vm0, %v986_v16, %v1034_v17 }
 0x381   : > { %1038 = vst.msk [vmem:[%s684_s5] sm:$0xff] %vm1037_vm8, %v1036_v18 }
 0x382   : > { %1678 = shalt.err (!%p1675_p12)
}
 0x383   : > { %1341 = dma.vmem_to_hbm [thread:$0]  (%p1921_p4), %s1060_s20, 128, %s1062_s27, %s1042_s15  }
 0x384 PF: > { %s2190_s16 = sld [smem:[#allocation23_spill]] }
 0x385   : > { %s2192_s18 = sld [smem:[#allocation25_spill]] }
 0x38a   : > { %s1087_s17 = sand.u32 1, %s2190_s16  }
 0x38b   : > { %p2193_p7 = scmp.ge.s32.totalorder %s2192_s18, 2  ;;  %s1088_s24 = scalar_lea.sflag [#allocation4], %s1087_s17 }
 0x38d   : > { %p1366_p9 = pnand %p2193_p7, %p1925_p6 }
 0x38f   : > { %p1367_p8 = pneg %p1366_p9 }
 0x391   : > { %1716 = dma.done.wait (%p1367_p8), %s1088_s24, 128  }
 0x392   : > { %1718 = vsyncadd (%p1367_p8), %s1088_s24, 4294967168  ;;  %s1098_s30 = scalar_lea.sflag [#allocation15], %s1087_s17 }
 0x393   : > { %1720 = dma.done.wait (%p1367_p8), %s1098_s30, 128  }
 0x394   : > { %1722 = vsyncadd (%p1367_p8), %s1098_s30, 4294967168  ;;  %s2194_s24 = sld [smem:[#allocation26_spill]]  ;;  %s2197_s21 = smov %s1729_s22 }
 0x395   : > { %s2195_s7 = sld [smem:[#allocation24_spill]] }
 0x396   : > { %s2196_s23 = sld [smem:[#allocation27_spill]] }
 0x39a   : > { %p38_p4 = scmp.ge.s32.totalorder %s2194_s24, 4  }
 0x39b   : > { %s2198_s22 = smov %s2195_s7 }
 0x39c   :  { %40 = sbr.rel (!%p38_p4) target bundleno = 20 (0x14), region = 180 }
 0x3a1   :  { %1104 = vsyncpa [#allocation3], 1 }
 0x3a2   :  { %1106 = vsyncpa [#allocation3 + $0x1], 1 }
 0x3a3   :  { %1107 = vsyncpa [#allocation6], 1 }
 0x3a4   :  { %1109 = vsyncpa [#allocation6 + $0x1], 1 }
 0x3a5   :  { %1110 = vsyncpa [#allocation9], 1 }
 0x3a6   :  { %1111 = vsyncpa [#allocation12], 1 }
 0x3a7   :  { %1112 = vsyncpa [#allocation4], 1 }
 0x3a8   :  { %1114 = vsyncpa [#allocation4 + $0x1], 1 }
 0x3a9   :  { %1115 = vsyncpa [#allocation15], 1 }
 0x3aa   :  { %1117 = vsyncpa [#allocation15 + $0x1], 1 }

</bundles_post_ra>
